<compile_context>
chip_gen: v7x
topology: tpu7x:2x2x1
jax: 0.10.0
libtpu: 0.0.40
codegen_flags: <defaults>
</compile_context>

<pallas_src>
import functools

import jax
import jax.numpy as jnp
from jax.experimental import pallas as pl
from jax.experimental.pallas import tpu as pltpu

LANE = 128            # TPU lane width; output last dim padded to a multiple
SUBLANE = 8           # f32 sublane multiple; batch tiles are multiples of this
MAX_TILE_M = 512      # upper bound on rows per grid step (v6e HBM-roofline sweet spot)
VMEM_BUDGET = 40 << 20  # conservative budget that fits v7x's 64 MiB physical VMEM


def _round_up(x, m):
    return (x + m - 1) // m * m


def mlp_kernel(x_ref, w0_ref, b0_ref, w1_ref, b1_ref, w2_ref, b2_ref, out_ref):
    # x arrives in f32 (no wrapper-side cast pass over HBM); cast on the tile.
    x = x_ref[...].astype(jnp.bfloat16)
    # layer 0: Linear(dim_in -> hidden) + ReLU   (bf16 MXU matmul, f32 accumulate)
    h = jnp.dot(x, w0_ref[...], preferred_element_type=jnp.float32)
    h = jnp.maximum(h + b0_ref[...], 0.0)
    # layer 1: Linear(hidden -> hidden) + ReLU
    h = jnp.dot(h.astype(jnp.bfloat16), w1_ref[...],
                preferred_element_type=jnp.float32)
    h = jnp.maximum(h + b1_ref[...], 0.0)
    # final layer: Linear(hidden -> dim_out_padded), Identity last activation
    o = jnp.dot(h.astype(jnp.bfloat16), w2_ref[...],
                preferred_element_type=jnp.float32)
    out_ref[...] = (o + b2_ref[...]).astype(out_ref.dtype)


def _plan(B, dim_in, dim_hidden, dim_out_p):
    """Choose TILE_M / buffering / VMEM limit from static shapes (Python ints)."""
    # Resident weights (bf16) + biases (f32).
    weight_bytes = 2 * (dim_in * dim_hidden + dim_hidden * dim_hidden
                        + dim_hidden * dim_out_p)
    weight_bytes += 4 * (2 * dim_hidden + dim_out_p)
    big_weights = weight_bytes > (4 << 20)
    w_buffers = 1 if big_weights else 2   # Buffered(1): fetched once, one buffer

    # Per-row VMEM: double-buffered f32 x/out tiles + live in-kernel intermediates
    # (f32 activation + bf16 copy per layer, final f32 accumulator).
    row_bytes = (2 * dim_in * 4 + 2 * dim_out_p * 4
                 + dim_hidden * (4 + 2) + dim_out_p * 4)

    cap = (VMEM_BUDGET - w_buffers * weight_bytes) // max(row_bytes, 1)
    cap = max(SUBLANE, min(MAX_TILE_M, (cap // SUBLANE) * SUBLANE))
    if B >= 256:
        # Make sure the "parallel" grid axis has >= 2 steps so both v7x
        # TensorCores get work (no-op on single-TC v5e/v6e).
        half = _round_up(-(-B // 2), SUBLANE)
        cap = min(cap, max(SUBLANE, half))
    tile_m = min(_round_up(B, SUBLANE), cap)

    vmem_bytes = w_buffers * weight_bytes + tile_m * row_bytes
    vmem_limit = int(min(64 << 20, max(32 << 20, int(vmem_bytes * 1.5))))
    return tile_m, big_weights, vmem_limit


def prepare_params(params):
    """One-time weight prep, hoisted out of the forward (no per-call HBM pass):
    pad the final layer's output dim to the 128-lane width and cast weights to
    bf16. Biases stay f32 for the f32 bias+ReLU epilogue."""
    w0, b0, w1, b1, w2, b2 = params
    dim_out = int(w2.shape[1])
    dim_out_p = _round_up(dim_out, LANE)
    pad = dim_out_p - dim_out
    w2p = jnp.pad(w2, ((0, 0), (0, pad)))
    b2p = jnp.pad(b2, ((0, 0), (0, pad)))
    prepared = (w0.astype(jnp.bfloat16), b0.astype(jnp.float32),
                w1.astype(jnp.bfloat16), b1.astype(jnp.float32),
                w2p.astype(jnp.bfloat16), b2p.astype(jnp.float32))
    return prepared, dim_out


@functools.partial(jax.jit, static_argnames=("dim_out",))
def mlp_forward(x, prepared, dim_out):
    """x: (B, ...) -> (regression (B, 1), classification (B, dim_out-1))."""
    w0, b0, w1, b1, w2, b2 = prepared
    B = x.shape[0]
    x2d = x.reshape(B, -1)                         # nn.Flatten()
    dim_in = x2d.shape[1]
    dim_hidden = w0.shape[1]
    dim_out_p = w2.shape[1]

    tile_m, big_weights, vmem_limit = _plan(B, dim_in, dim_hidden, dim_out_p)
    m_pad = _round_up(B, tile_m)
    if m_pad != B:                                 # only pad when genuinely needed
        x2d = jnp.pad(x2d, ((0, m_pad - B), (0, 0)))

    grid = (m_pad // tile_m,)

    def resident(shape):
        # Constant index_map -> fetched once and held resident across the grid.
        # Single-buffer it when the weights are large (halves resident VMEM,
        # matters on v7x's 64 MiB).
        if big_weights:
            return pl.BlockSpec(shape, lambda i: (0, 0),
                                pipeline_mode=pl.Buffered(1))
        return pl.BlockSpec(shape, lambda i: (0, 0))

    flops = 2 * m_pad * (dim_in * dim_hidden + dim_hidden * dim_hidden
                         + dim_hidden * dim_out_p)
    bytes_accessed = (
        m_pad * dim_in * 4                                              # x (f32)
        + (dim_in * dim_hidden + dim_hidden * dim_hidden
           + dim_hidden * dim_out_p) * 2                                # weights (bf16)
        + (2 * dim_hidden + dim_out_p) * 4                              # biases (f32)
        + m_pad * dim_out_p * 4)                                        # out (f32)

    out = pl.pallas_call(
        mlp_kernel,
        out_shape=jax.ShapeDtypeStruct((m_pad, dim_out_p), jnp.float32),
        grid=grid,
        in_specs=[
            pl.BlockSpec((tile_m, dim_in), lambda i: (i, 0)),   # x tile (streamed)
            resident((dim_in, dim_hidden)),                     # w0
            resident((1, dim_hidden)),                          # b0
            resident((dim_hidden, dim_hidden)),                 # w1
            resident((1, dim_hidden)),                          # b1
            resident((dim_hidden, dim_out_p)),                  # w2
            resident((1, dim_out_p)),                           # b2
        ],
        out_specs=pl.BlockSpec((tile_m, dim_out_p), lambda i: (i, 0)),
        compiler_params=pltpu.CompilerParams(
            dimension_semantics=("parallel",),
            vmem_limit_bytes=vmem_limit),
        cost_estimate=pl.CostEstimate(
            flops=flops, transcendentals=0, bytes_accessed=bytes_accessed),
    )(x2d, w0, b0, w1, b1, w2, b2)

    out = out[:B, :dim_out]
    # output[:, 0].unsqueeze(1), output[:, 1:]  — as XLA slices inside the jit
    regression_output = out[:, 0:1]
    classification_output = out[:, 1:]
    return regression_output, classification_output


def init_params(key, dim_in, dim_hidden, dim_out):
    """Deterministic PyTorch-style (Kaiming-uniform-ish) init; weights (in, out)."""
    ks = jax.random.split(key, 6)

    def linear(kw, kb, fan_in, fan_out):
        bound = 1.0 / jnp.sqrt(fan_in)
        w = jax.random.uniform(kw, (fan_in, fan_out), jnp.float32, -bound, bound)
        b = jax.random.uniform(kb, (1, fan_out), jnp.float32, -bound, bound)
        return w, b

    w0, b0 = linear(ks[0], ks[1], dim_in, dim_hidden)
    w1, b1 = linear(ks[2], ks[3], dim_hidden, dim_hidden)
    w2, b2 = linear(ks[4], ks[5], dim_hidden, dim_out)
    return (w0, b0, w1, b1, w2, b2)


def reference_forward(x, params):
    """Pure-JAX f32 reference for correctness check."""
    B = x.shape[0]
    h = x.reshape(B, -1)
    w0, b0, w1, b1, w2, b2 = params
    h = jnp.maximum(h @ w0 + b0, 0.0)
    h = jnp.maximum(h @ w1 + b1, 0.0)
    o = h @ w2 + b2
    return o[:, 0:1], o[:, 1:]


if __name__ == "__main__":
    # MLP(dim_in=16, dim_out=8, dim_hidden=256, hidden_depth=2)
    B, DIM_IN, DIM_HIDDEN, DIM_OUT = 8, 16, 256, 8

    key = jax.random.PRNGKey(0)
    kx, kp = jax.random.split(key)
    # Non-flat input exercises the nn.Flatten(): (8, 4, 4) -> (8, 16).
    x = jax.random.normal(kx, (B, 4, 4), dtype=jnp.float32)
    params = init_params(kp, DIM_IN, DIM_HIDDEN, DIM_OUT)

    prepared, dim_out = prepare_params(params)   # one-time bf16/pad prep (hoisted)
    reg, cls = mlp_forward(x, prepared, dim_out=dim_out)
    jax.block_until_ready((reg, cls))

    reg_ref, cls_ref = reference_forward(x, params)
    assert reg.shape == (B, 1) and cls.shape == (B, DIM_OUT - 1)
    # bf16 matmuls with f32 accumulation -> compare loosely against f32 reference.
    assert jnp.allclose(reg, reg_ref, atol=2e-2, rtol=2e-2)
    assert jnp.allclose(cls, cls_ref, atol=2e-2, rtol=2e-2)

    print("KERNEL_OK")
</pallas_src>

<mosaic_0001>
module attributes {stable_mosaic.version = 11 : i64} {
  func.func @mlp_kernel(%arg0: i32, %arg1: memref<8x16xf32, #tpu.memory_space<vmem>>, %arg2: memref<16x256xbf16, #tpu.memory_space<vmem>>, %arg3: memref<1x256xf32, #tpu.memory_space<vmem>>, %arg4: memref<256x256xbf16, #tpu.memory_space<vmem>>, %arg5: memref<1x256xf32, #tpu.memory_space<vmem>>, %arg6: memref<256x128xbf16, #tpu.memory_space<vmem>>, %arg7: memref<1x128xf32, #tpu.memory_space<vmem>>, %arg8: memref<8x128xf32, #tpu.memory_space<vmem>>) attributes {dimension_semantics = [#tpu.dimension_semantics<parallel>], iteration_bounds = array<i64: 1>, scalar_prefetch = 0 : i64, scratch_operands = 0 : i64, tpu.core_type = #tpu.core_type<tc>, window_params = [{transform_indices = @transform_0, window_bounds = array<i64: 8, 16>}, {pipeline_mode = #tpu.pipeline_mode<synchronous>, transform_indices = @transform_1, window_bounds = array<i64: 16, 256>}, {pipeline_mode = #tpu.pipeline_mode<synchronous>, transform_indices = @transform_2, window_bounds = array<i64: 1, 256>}, {pipeline_mode = #tpu.pipeline_mode<synchronous>, transform_indices = @transform_3, window_bounds = array<i64: 256, 256>}, {pipeline_mode = #tpu.pipeline_mode<synchronous>, transform_indices = @transform_4, window_bounds = array<i64: 1, 256>}, {pipeline_mode = #tpu.pipeline_mode<synchronous>, transform_indices = @transform_5, window_bounds = array<i64: 256, 128>}, {pipeline_mode = #tpu.pipeline_mode<synchronous>, transform_indices = @transform_6, window_bounds = array<i64: 1, 128>}, {transform_indices = @transform_7, window_bounds = array<i64: 8, 128>}]} {
    %c0 = arith.constant 0 : index
    %c0_0 = arith.constant 0 : index
    %0 = vector.load %arg1[%c0, %c0_0] : memref<8x16xf32, #tpu.memory_space<vmem>>, vector<8x16xf32>
    %1 = arith.truncf %0 : vector<8x16xf32> to vector<8x16xbf16>
    %c0_1 = arith.constant 0 : index
    %c0_2 = arith.constant 0 : index
    %2 = vector.load %arg2[%c0_1, %c0_2] : memref<16x256xbf16, #tpu.memory_space<vmem>>, vector<16x256xbf16>
    %cst = arith.constant dense<0.000000e+00> : vector<8x256xf32>
    %3 = tpu.matmul %1, %2, %cst {dimension_numbers = #tpu.dot_dimension_numbers<[1], [0], [0], [1], [0, 0, 1, 1], [], []>} : vector<8x16xbf16>, vector<16x256xbf16>, vector<8x256xf32> -> vector<8x256xf32>
    %c0_3 = arith.constant 0 : index
    %c0_4 = arith.constant 0 : index
    %4 = vector.load %arg3[%c0_3, %c0_4] : memref<1x256xf32, #tpu.memory_space<vmem>>, vector<1x256xf32>
    %5 = vector.broadcast %4 : vector<1x256xf32> to vector<8x256xf32>
    %6 = arith.addf %3, %5 : vector<8x256xf32>
    %cst_5 = arith.constant 0.000000e+00 : f32
    %7 = vector.broadcast %cst_5 : f32 to vector<8x256xf32>
    %8 = arith.maximumf %6, %7 : vector<8x256xf32>
    %9 = arith.truncf %8 : vector<8x256xf32> to vector<8x256xbf16>
    %c0_6 = arith.constant 0 : index
    %c0_7 = arith.constant 0 : index
    %10 = vector.load %arg4[%c0_6, %c0_7] : memref<256x256xbf16, #tpu.memory_space<vmem>>, vector<256x256xbf16>
    %cst_8 = arith.constant dense<0.000000e+00> : vector<8x256xf32>
    %11 = tpu.matmul %9, %10, %cst_8 {dimension_numbers = #tpu.dot_dimension_numbers<[1], [0], [0], [1], [0, 0, 1, 1], [], []>} : vector<8x256xbf16>, vector<256x256xbf16>, vector<8x256xf32> -> vector<8x256xf32>
    %c0_9 = arith.constant 0 : index
    %c0_10 = arith.constant 0 : index
    %12 = vector.load %arg5[%c0_9, %c0_10] : memref<1x256xf32, #tpu.memory_space<vmem>>, vector<1x256xf32>
    %13 = vector.broadcast %12 : vector<1x256xf32> to vector<8x256xf32>
    %14 = arith.addf %11, %13 : vector<8x256xf32>
    %cst_11 = arith.constant 0.000000e+00 : f32
    %15 = vector.broadcast %cst_11 : f32 to vector<8x256xf32>
    %16 = arith.maximumf %14, %15 : vector<8x256xf32>
    %17 = arith.truncf %16 : vector<8x256xf32> to vector<8x256xbf16>
    %c0_12 = arith.constant 0 : index
    %c0_13 = arith.constant 0 : index
    %18 = vector.load %arg6[%c0_12, %c0_13] : memref<256x128xbf16, #tpu.memory_space<vmem>>, vector<256x128xbf16>
    %cst_14 = arith.constant dense<0.000000e+00> : vector<8x128xf32>
    %19 = tpu.matmul %17, %18, %cst_14 {dimension_numbers = #tpu.dot_dimension_numbers<[1], [0], [0], [1], [0, 0, 1, 1], [], []>} : vector<8x256xbf16>, vector<256x128xbf16>, vector<8x128xf32> -> vector<8x128xf32>
    %c0_15 = arith.constant 0 : index
    %c0_16 = arith.constant 0 : index
    %20 = vector.load %arg7[%c0_15, %c0_16] : memref<1x128xf32, #tpu.memory_space<vmem>>, vector<1x128xf32>
    %21 = vector.broadcast %20 : vector<1x128xf32> to vector<8x128xf32>
    %22 = arith.addf %19, %21 : vector<8x128xf32>
    %c0_17 = arith.constant 0 : index
    %c0_18 = arith.constant 0 : index
    %23 = vector.load %arg8[%c0_17, %c0_18] : memref<8x128xf32, #tpu.memory_space<vmem>>, vector<8x128xf32>
    tpu.vector_store %arg8[%c0_17, %c0_18], %22 {strides = array<i32>} : memref<8x128xf32, #tpu.memory_space<vmem>>, vector<8x128xf32>,
    return
  }
  func.func @transform_0(%arg0: i32) -> (i32, i32) {
    %c0_i32 = arith.constant 0 : i32
    %c0_i32_0 = arith.constant 0 : i32
    return %arg0, %c0_i32 : i32, i32
  }
  func.func @transform_1(%arg0: i32) -> (i32, i32) {
    %c0_i32 = arith.constant 0 : i32
    %c0_i32_0 = arith.constant 0 : i32
    %c0_i32_1 = arith.constant 0 : i32
    return %c0_i32, %c0_i32_0 : i32, i32
  }
  func.func @transform_2(%arg0: i32) -> (i32, i32) {
    %c0_i32 = arith.constant 0 : i32
    %c0_i32_0 = arith.constant 0 : i32
    %c0_i32_1 = arith.constant 0 : i32
    return %c0_i32, %c0_i32_0 : i32, i32
  }
  func.func @transform_3(%arg0: i32) -> (i32, i32) {
    %c0_i32 = arith.constant 0 : i32
    %c0_i32_0 = arith.constant 0 : i32
    %c0_i32_1 = arith.constant 0 : i32
    return %c0_i32, %c0_i32_0 : i32, i32
  }
  func.func @transform_4(%arg0: i32) -> (i32, i32) {
    %c0_i32 = arith.constant 0 : i32
    %c0_i32_0 = arith.constant 0 : i32
    %c0_i32_1 = arith.constant 0 : i32
    return %c0_i32, %c0_i32_0 : i32, i32
  }
  func.func @transform_5(%arg0: i32) -> (i32, i32) {
    %c0_i32 = arith.constant 0 : i32
    %c0_i32_0 = arith.constant 0 : i32
    %c0_i32_1 = arith.constant 0 : i32
    return %c0_i32, %c0_i32_0 : i32, i32
  }
  func.func @transform_6(%arg0: i32) -> (i32, i32) {
    %c0_i32 = arith.constant 0 : i32
    %c0_i32_0 = arith.constant 0 : i32
    %c0_i32_1 = arith.constant 0 : i32
    return %c0_i32, %c0_i32_0 : i32, i32
  }
  func.func @transform_7(%arg0: i32) -> (i32, i32) {
    %c0_i32 = arith.constant 0 : i32
    %c0_i32_0 = arith.constant 0 : i32
    return %arg0, %c0_i32 : i32, i32
  }
}

</mosaic_0001>

<bundles_post_ra>
// kernel: mlp_forward.1
= control target key start
LH: loop header
LB: loop body
LE: loop exit
PB: predicated region body
PF: predicated region fallthrough
CT: control target
= control target key end

     0   :  { %12 = vsyncpa [#allocation3], 0  ;;  %s849_s0 = inlined_call_operand.vmem [shape: f32[8,16], index: 0, kind: input, shape index: {}]   ;;  %s850_s1 = inlined_call_operand.vmem [shape: bf16[16,256], index: 1, kind: input, shape index: {}]   ;;  %s851_s2 = inlined_call_operand.vmem [shape: f32[1,256], index: 2, kind: input, shape index: {}]   ;;  %s852_s3 = inlined_call_operand.hbm [shape: bf16[256,256], index: 3, kind: input, shape index: {}]   ;;  %s853_s4 = inlined_call_operand.vmem [shape: f32[1,256], index: 4, kind: input, shape index: {}]   ;;  %s854_s5 = inlined_call_operand.hbm [shape: bf16[256,128], index: 5, kind: input, shape index: {}]   ;;  %s855_s6 = inlined_call_operand.vmem [shape: f32[1,128], index: 6, kind: input, shape index: {}]   ;;  %s856_s7 = inlined_call_operand.vmem [shape: f32[8,128], index: 7, kind: output, shape index: {}]  }
   0x1   :  { %13 = vsyncpa [#allocation5], 0  ;;  %s757_s24 = smov [#allocation2]   ;;  %s709_s28 = scalar_lea.hbm %s852_s3, 4096 }
   0x2   :  { %s25_s25 = sshll.u32 %s757_s24, 4  ;;  %p710_p0 = scmp.ne.s32.totalorder %s852_s3, %s709_s28  ;;  %s26_s25 = int_to_ptr.vmem [resolvable:$true] %s25_s25 }
   0x3   :  { %p713_p1 = scmp.lt.u32.totalorder %s709_s28, %s852_s3 }
   0x5   :  { %p715_p2 = pnand %p713_p1, %p710_p0 }
   0x7   :  { %718 = shalt.err (!%p715_p2)
}
   0x8   :  { %s719_s10 = scalar_lea.vmem %s26_s25, 4096  ;;  %p724_p4 = scmp.lt.s32.totalorder %s26_s25, %s26_s25 }
   0x9   :  { %p720_p3 = scmp.ne.s32.totalorder %s26_s25, %s719_s10  ;;  %p725_p5 = scmp.lt.s32.totalorder %s719_s10, %s719_s10 }
   0xb   :  { %p726_p6 = por %p725_p5, %p724_p4 }
   0xd   :  { %p727_p7 = pnand %p726_p6, %p720_p3 }
   0xf   :  { %730 = shalt.err (!%p727_p7)
}
  0x10   :  { %s758_s11 = smov 128   ;;  %s759_s12 = smov 8  }
  0x11   :  { %31 = dma.hbm_to_vmem [thread:$0]  %s852_s3, 4096, %s26_s25, [#allocation3], %s758_s11, %s758_s11, %s759_s12  }
  0x12   :  { %s760_s15 = smov [#allocation4]   ;;  %s731_s19 = scalar_lea.hbm %s854_s5, 2048 }
  0x13   :  { %s39_s16 = sshll.u32 %s760_s15, 4  ;;  %p732_p8 = scmp.ne.s32.totalorder %s854_s5, %s731_s19  ;;  %s40_s16 = int_to_ptr.vmem [resolvable:$true] %s39_s16 }
  0x14   :  { %p735_p9 = scmp.lt.u32.totalorder %s731_s19, %s854_s5 }
  0x16   :  { %p737_p10 = pnand %p735_p9, %p732_p8 }
  0x18   :  { %740 = shalt.err (!%p737_p10)
}
  0x19   :  { %s741_s24 = scalar_lea.vmem %s40_s16, 2048  ;;  %p746_p12 = scmp.lt.s32.totalorder %s40_s16, %s40_s16 }
  0x1a   :  { %p742_p11 = scmp.ne.s32.totalorder %s40_s16, %s741_s24  ;;  %p747_p13 = scmp.lt.s32.totalorder %s741_s24, %s741_s24 }
  0x1c   :  { %p748_p0 = por %p747_p13, %p746_p12 }
  0x1e   :  { %p749_p1 = pnand %p748_p0, %p742_p11 }
  0x20   :  { %752 = shalt.err (!%p749_p1)
}
  0x21   :  { %s761_s3 = smov 64   ;;  %s762_s25 = smov 4  }
  0x22   :  { %45 = dma.hbm_to_vmem [thread:$0]  %s854_s5, 2048, %s40_s16, [#allocation5], %s761_s3, %s761_s3, %s762_s25  }
  0x23   :  { %753 = dma.done.wait [#allocation3], 4096  }
  0x24   :  { %754 = vsyncadd [#allocation3], 4294963200 }
  0x25   :  { %755 = dma.done.wait [#allocation5], 2048  }
  0x26   :  { %756 = vsyncadd [#allocation5], 4294965248  ;;  %v763_v0 = vmov 0   ;;  %v642_v1 = vld [vmem:[%s850_s1 + $0x4] ss:$8 sps:$4 sm:$0xff]   ;;  %vm81_vm0 = vcmask 130048   ;;  %v61_v49 = vlaneseq }
  0x27   :  { %117 = vmatprep.mubr.bf16.mxu0 %v763_v0  ;;  %v644_v2 = vld [vmem:[%s850_s1] ss:$8 sps:$4 sm:$0xff]   ;;  %85 = vmatprep.subr.bf16.mxu0 %v642_v1  ;;  %v645_v5 = vld [vmem:[#allocation2 + $0x4] ss:$8 sps:$4 sm:$0xff]   ;;  %v648_v7 = vld [vmem:[#allocation2 + $0x14] ss:$8 sps:$4 sm:$0xff]  }
  0x28   :  { %v55_v3 = vld [vmem:[%s849_s0] sm:$0xff]  ;;  %86 = vmatpush1.bf16.msra.mxu0 %v644_v2  ;;  %334 = vmatprep.subr.bf16.mxu1 %v645_v5  ;;  %v650_v8 = vld [vmem:[#allocation2 + $0x10] ss:$8 sps:$4 sm:$0xff]   ;;  %v654_v11 = vld [vmem:[#allocation2 + $0x34] ss:$8 sps:$4 sm:$0xff]   ;;  %v62_v50 = vshrl.u32 %v61_v49, 7 }
  0x29   :  { %v56_v4 = vpack.c.bf16 %v55_v3, %v55_v3  ;;  %v647_v6 = vld [vmem:[#allocation2] ss:$8 sps:$4 sm:$0xff]   ;;  %v651_v9 = vld [vmem:[#allocation2 + $0x24] ss:$8 sps:$4 sm:$0xff]   ;;  %v656_v12 = vld [vmem:[#allocation2 + $0x30] ss:$8 sps:$4 sm:$0xff]  }
  0x2a   :  { %335 = vmatpush1.bf16.msra.mxu1 %v647_v6  ;;  %v653_v10 = vld [vmem:[#allocation2 + $0x20] ss:$8 sps:$4 sm:$0xff]   ;;  %v657_v13 = vld [vmem:[#allocation2 + $0x44] ss:$8 sps:$4 sm:$0xff]   ;;  %v660_v15 = vld [vmem:[#allocation2 + $0x54] ss:$8 sps:$4 sm:$0xff]  }
  0x2b   :  { %563 = vmatmul.mubr.msk.bf16.vlgmr.msra.gmra.mrb[0].mxu0 %vm81_vm0, %v56_v4  ;;  %336 = vmatprep.subr.bf16.mxu1 %v648_v7  ;;  %v659_v14 = vld [vmem:[#allocation2 + $0x40] ss:$8 sps:$4 sm:$0xff]   ;;  %v662_v16 = vld [vmem:[#allocation2 + $0x50] ss:$8 sps:$4 sm:$0xff]   ;;  %v663_v17 = vld [vmem:[#allocation2 + $0x64] ss:$8 sps:$4 sm:$0xff]  }
  0x2c   :  { %v665_v18 = vld [vmem:[#allocation2 + $0x60] ss:$8 sps:$4 sm:$0xff]   ;;  %v666_v19 = vld [vmem:[#allocation2 + $0x74] ss:$8 sps:$4 sm:$0xff]   ;;  %v668_v20 = vld [vmem:[#allocation2 + $0x70] ss:$8 sps:$4 sm:$0xff]  }
  0x2d   :  { %v669_v21 = vld [vmem:[#allocation2 + $0x84] ss:$8 sps:$4 sm:$0xff]   ;;  %v671_v22 = vld [vmem:[#allocation2 + $0x80] ss:$8 sps:$4 sm:$0xff]   ;;  %v672_v23 = vld [vmem:[#allocation2 + $0x94] ss:$8 sps:$4 sm:$0xff]  }
  0x2e   :  { %337 = vmatpush1.bf16.msra.mxu1 %v650_v8  ;;  %v674_v24 = vld [vmem:[#allocation2 + $0x90] ss:$8 sps:$4 sm:$0xff]   ;;  %v675_v25 = vld [vmem:[#allocation2 + $0xa4] ss:$8 sps:$4 sm:$0xff]   ;;  %v677_v26 = vld [vmem:[#allocation2 + $0xa0] ss:$8 sps:$4 sm:$0xff]  }
  0x2f   :  { %338 = vmatprep.subr.bf16.mxu1 %v651_v9  ;;  %v678_v27 = vld [vmem:[#allocation2 + $0xb4] ss:$8 sps:$4 sm:$0xff]   ;;  %v680_v28 = vld [vmem:[#allocation2 + $0xb0] ss:$8 sps:$4 sm:$0xff]   ;;  %v681_v29 = vld [vmem:[#allocation2 + $0xc4] ss:$8 sps:$4 sm:$0xff]  }
  0x30   :  { %v683_v30 = vld [vmem:[#allocation2 + $0xc0] ss:$8 sps:$4 sm:$0xff]   ;;  %v684_v31 = vld [vmem:[#allocation2 + $0xd4] ss:$8 sps:$4 sm:$0xff]   ;;  %v686_v32 = vld [vmem:[#allocation2 + $0xd0] ss:$8 sps:$4 sm:$0xff]  }
  0x31   :  { %v687_v33 = vld [vmem:[#allocation2 + $0xe4] ss:$8 sps:$4 sm:$0xff]   ;;  %v689_v34 = vld [vmem:[#allocation2 + $0xe0] ss:$8 sps:$4 sm:$0xff]   ;;  %v690_v35 = vld [vmem:[#allocation2 + $0xf4] ss:$8 sps:$4 sm:$0xff]  }
  0x32   :  { %339 = vmatpush1.bf16.msra.mxu1 %v653_v10  ;;  %v692_v36 = vld [vmem:[#allocation2 + $0xf0] ss:$8 sps:$4 sm:$0xff]   ;;  %v693_v37 = vld [vmem:[#allocation4 + $0x40] sm:$0xff]   ;;  %v695_v39 = vld [vmem:[#allocation4 + $0x48] sm:$0xff]   ;;  %v63_v51 = vsub.s32 0, %v62_v50  ;;  %v67_v53 = vsub.s32 1, %v62_v50 }
  0x33   :  { %340 = vmatprep.subr.bf16.mxu1 %v654_v11  ;;  %v694_v38 = vld [vmem:[#allocation4] sm:$0xff]   ;;  %613 = vmatprep.subr.bf16.mxu0 %v693_v37  ;;  %v696_v40 = vld [vmem:[#allocation4 + $0x8] sm:$0xff]   ;;  %v697_v41 = vld [vmem:[#allocation4 + $0x50] sm:$0xff]  }
  0x34   :  { %614 = vmatpush3.bf16.msra.mxu0 %v694_v38  ;;  %v698_v42 = vld [vmem:[#allocation4 + $0x10] sm:$0xff]   ;;  %v699_v43 = vld [vmem:[#allocation4 + $0x58] sm:$0xff]   ;;  %v701_v45 = vld [vmem:[#allocation4 + $0x60] sm:$0xff]  }
  0x35   :  { %615 = vmatprep.subr.bf16.mxu0 %v695_v39  ;;  %v700_v44 = vld [vmem:[#allocation4 + $0x18] sm:$0xff]   ;;  %v702_v46 = vld [vmem:[#allocation4 + $0x20] sm:$0xff]   ;;  %v703_v47 = vld [vmem:[#allocation4 + $0x68] sm:$0xff]  }
  0x36   :  { %341 = vmatpush1.bf16.msra.mxu1 %v656_v12  ;;  %v704_v48 = vld [vmem:[#allocation4 + $0x28] sm:$0xff]   ;;  %v59_v52 = vld [vmem:[%s851_s2] sm:$0x3]  ;;  %v705_v2 = vld [vmem:[#allocation4 + $0x70] sm:$0xff]  }
  0x37   :  { %342 = vmatprep.subr.bf16.mxu1 %v657_v13  ;;  %v64_v54 = vrot.slane %v59_v52, %v63_v51  ;;  %v68_v55 = vrot.slane %v59_v52, %v67_v53  ;;  %v706_v3 = vld [vmem:[#allocation4 + $0x30] sm:$0xff]   ;;  %v707_v4 = vld [vmem:[#allocation4 + $0x78] sm:$0xff]   ;;  %v162_v6 = vld [vmem:[%s853_s4] sm:$0x3] }
  0x38   :  { %616 = vmatpush3.bf16.msra.mxu0 %v696_v40  ;;  %v708_v5 = vld [vmem:[#allocation4 + $0x38] sm:$0xff]   ;;  %v167_v7 = vrot.slane %v162_v6, %v63_v51  ;;  %v171_v8 = vrot.slane %v162_v6, %v67_v53 }
  0x39   :  { %617 = vmatprep.subr.bf16.mxu0 %v697_v41 }
  0x3a   :  { %343 = vmatpush1.bf16.msra.mxu1 %v659_v14 }
  0x3b   :  { %344 = vmatprep.subr.bf16.mxu1 %v660_v15 }
  0x3c   :  { %618 = vmatpush3.bf16.msra.mxu0 %v698_v42 }
  0x3d   :  { %619 = vmatprep.subr.bf16.mxu0 %v699_v43 }
  0x3e   :  { %345 = vmatpush1.bf16.msra.mxu1 %v662_v16 }
  0x3f   :  { %346 = vmatprep.subr.bf16.mxu1 %v663_v17 }
  0x40   :  { %620 = vmatpush3.bf16.msra.mxu0 %v700_v44 }
  0x41   :  { %621 = vmatprep.subr.bf16.mxu0 %v701_v45 }
  0x42   :  { %347 = vmatpush1.bf16.msra.mxu1 %v665_v18 }
  0x43   :  { %348 = vmatprep.subr.bf16.mxu1 %v666_v19 }
  0x44   :  { %622 = vmatpush3.bf16.msra.mxu0 %v702_v46 }
  0x45   :  { %623 = vmatprep.subr.bf16.mxu0 %v703_v47 }
  0x46   :  { %349 = vmatpush1.bf16.msra.mxu1 %v668_v20  ;;  %v596_v20 = vld [vmem:[%s855_s6] ss:$0 sm:$0xff] }
  0x47   :  { %350 = vmatprep.subr.bf16.mxu1 %v669_v21 }
  0x48   :  { %624 = vmatpush3.bf16.msra.mxu0 %v704_v48 }
  0x49   :  { %625 = vmatprep.subr.bf16.mxu0 %v705_v2 }
  0x4a   :  { %351 = vmatpush1.bf16.msra.mxu1 %v671_v22 }
  0x4b   :  { %352 = vmatprep.subr.bf16.mxu1 %v672_v23 }
  0x4c   :  { %626 = vmatpush3.bf16.msra.mxu0 %v706_v3 }
  0x4d   :  { %627 = vmatprep.subr.bf16.mxu0 %v707_v4 }
  0x4e   :  { %353 = vmatpush1.bf16.msra.mxu1 %v674_v24 }
  0x4f   :  { %354 = vmatprep.subr.bf16.mxu1 %v675_v25 }
  0x50   :  { %628 = vmatpush3.bf16.msra.mxu0 %v708_v5 }
  0x52   :  { %355 = vmatpush1.bf16.msra.mxu1 %v677_v26 }
  0x53   :  { %356 = vmatprep.subr.bf16.mxu1 %v678_v27 }
  0x56   :  { %357 = vmatpush1.bf16.msra.mxu1 %v680_v28 }
  0x57   :  { %358 = vmatprep.subr.bf16.mxu1 %v681_v29 }
  0x5a   :  { %359 = vmatpush1.bf16.msra.mxu1 %v683_v30 }
  0x5b   :  { %360 = vmatprep.subr.bf16.mxu1 %v684_v31 }
  0x5e   :  { %361 = vmatpush1.bf16.msra.mxu1 %v686_v32 }
  0x5f   :  { %362 = vmatprep.subr.bf16.mxu1 %v687_v33 }
  0x62   :  { %363 = vmatpush1.bf16.msra.mxu1 %v689_v34 }
  0x63   :  { %364 = vmatprep.subr.bf16.mxu1 %v690_v35 }
  0x66   :  { %365 = vmatpush1.bf16.msra.mxu1 %v692_v36 }
  0xfe   :  { %v119_v56 = vpop.f32.mrb[0].mxu0 }
  0xff   :  { %v120_v57 = vadd.f32 %v119_v56, %v64_v54  ;;  %v121_v58 = vpop.f32.mrb[1].mxu0 }
 0x100   :  { %v122_v59 = vadd.f32 %v121_v58, %v68_v55  ;;  %v123_v60 = vpop.f32.mrb[2].mxu0 }
 0x101   :  { %v126_v61 = vmax.f32 %v120_v57, 0.0  ;;  %v124_v62 = vpop.f32.mrb[3].mxu0 }
 0x102   :  { %v127_v63 = vmax.f32 %v122_v59, 0.0 }
 0x103   :  { %v128_v1 = vpack.c.bf16 %v126_v61, %v126_v61 }
 0x104   :  { %v129_v0 = vpack.c.bf16 %v127_v63, %v127_v63 }
 0x106   :  { %366 = vmatprep.mubr.bf16.mxu1 %v129_v0 }
 0x107   :  { %367 = vmatmul.mubr.bf16.vlgmr.msra.gmra.mrb[0].mxu1 %v128_v1 }
 0x1da   :  { %v368_v9 = vpop.f32.mrb[0].mxu1 }
 0x1db   :  { %v369_v10 = vadd.f32 %v368_v9, %v167_v7  ;;  %v370_v11 = vpop.f32.mrb[1].mxu1 }
 0x1dc   :  { %v371_v12 = vadd.f32 %v370_v11, %v171_v8  ;;  %v372_v13 = vpop.f32.mrb[2].mxu1 }
 0x1dd   :  { %v375_v14 = vmax.f32 %v369_v10, 0.0  ;;  %v373_v15 = vpop.f32.mrb[3].mxu1 }
 0x1de   :  { %v376_v16 = vmax.f32 %v371_v12, 0.0 }
 0x1df   :  { %v377_v18 = vpack.c.bf16 %v375_v14, %v375_v14 }
 0x1e0   :  { %v378_v17 = vpack.c.bf16 %v376_v16, %v376_v16 }
 0x1e2   :  { %546 = vmatprep.mubr.bf16.mxu0 %v378_v17 }
 0x1e3   :  { %547 = vmatmul.mubr.bf16.vlgmr.msra.gmra.mrb[4].mxu0 %v377_v18 }
 0x2b6   :  { %v629_v19 = vpop.f32.mrb[4].mxu0 }
 0x2b7   :  { %v630_v21 = vpop.f32.mrb[5].mxu0 }
 0x2b8   :  { %v631_v22 = vadd.f32 %v630_v21, %v629_v19  ;;  %v632_v23 = vpop.f32.mrb[6].mxu0 }
 0x2b9   :  { %v633_v24 = vpop.f32.mrb[7].mxu0 }
 0x2ba   :  { %v549_v25 = vadd.f32 %v631_v22, %v596_v20 }
 0x2bc   :  { %554 = vst [vmem:[%s856_s7] sm:$0xff] %v549_v25 }
 0x2bd   :  { %559 = vsyncpa [#allocation3], 1 }
 0x2be   :  { %560 = vsyncpa [#allocation5], 1 }

</bundles_post_ra>
